<compile_context>
chip_gen: v5e
topology: v5e:2x2
jax: 0.10.0
libtpu: 0.0.40
codegen_flags: <defaults>
</compile_context>

<pallas_src>
import functools

import jax
import jax.numpy as jnp
from jax.experimental import pallas as pl
from jax.experimental.pallas import tpu as pltpu


def _round_up(x, m):
    return ((x + m - 1) // m) * m


def mlp_kernel(x_ref, w1_ref, b1_ref, w2_ref, b2_ref, w3_ref, b3_ref, o_ref):
    """Fused Flatten->Linear->ReLU->Linear->ReLU->Linear on one (TM, 200) tile."""
    cdt = w1_ref.dtype  # streaming/compute dtype (bf16 by default, f32 optional)
    x = x_ref[...]
    h1 = jnp.maximum(
        jnp.dot(x, w1_ref[...], preferred_element_type=jnp.float32) + b1_ref[...],
        0.0,
    ).astype(cdt)
    h2 = jnp.maximum(
        jnp.dot(h1, w2_ref[...], preferred_element_type=jnp.float32) + b2_ref[...],
        0.0,
    ).astype(cdt)
    o_ref[...] = (
        jnp.dot(h2, w3_ref[...], preferred_element_type=jnp.float32) + b3_ref[...]
    ).astype(o_ref.dtype)


def _choose_tm(batch, tm_cap):
    """Batch tile size: 8-aligned, capped, >= 2 grid steps when possible."""
    if batch <= 8:
        return batch  # single (possibly ragged) tile; block dims == array dims
    # >= 2 grid steps so the "parallel" batch axis can shard across both
    # TensorCores on v7x; 8-aligned so the x/out blocks satisfy (8, 128) tiling
    # without padding the batch.
    return max(8, min(tm_cap, _round_up(pl.cdiv(batch, 2), 8)))


def _vmem_limit_bytes(tm, k, size, n_out, wbytes, single_buffer_weights):
    """VMEM requirement: streamed tiles + resident params + live intermediates."""
    def tile(r, c, b):  # (8,128)-padded VMEM footprint of an (r, c) tile
        return _round_up(max(r, 1), 8) * _round_up(max(c, 1), 128) * b

    x_stream = 2 * tile(tm, k, wbytes)        # double-buffered x tiles
    o_stream = 2 * tile(tm, n_out, 4)         # double-buffered output tiles
    weights = (
        tile(k, size, wbytes) + tile(size, size, wbytes) + tile(size, n_out, wbytes)
        + 2 * tile(1, size, 4) + tile(1, n_out, 4)
    )
    if not single_buffer_weights:
        weights *= 2                          # default pipelining double-buffers
    live = 2 * tile(tm, size, 4)              # h1 / h2 f32 intermediates
    need = x_stream + o_stream + weights + live
    need = int(need * 1.25) + (4 << 20)       # compiler / MXU scratch headroom

    try:
        cap = pltpu.get_tpu_info().vmem_capacity_bytes
    except Exception:
        cap = 64 * 1024 * 1024                # conservative (v7x physical VMEM)
    ceiling = int(cap * 0.8)                  # ~51 MiB v7x, ~102 MiB v5e/v6e
    return int(min(max(need, 16 * 1024 * 1024), ceiling))


@functools.partial(
    jax.jit, static_argnames=("tm", "compute_dtype", "single_buffer_weights")
)
def _net1_forward(x, params, *, tm, compute_dtype, single_buffer_weights):
    w1, b1, w2, b2, w3, b3 = params
    B = x.shape[0]
    K = w1.shape[0]        # 200
    size = w1.shape[1]     # hidden width
    n_out = w3.shape[1]    # 5

    # Row-major flatten == nn.Flatten; stream x/weights in compute_dtype,
    # biases stay f32 (added to the f32 MXU accumulator).
    x_flat = x.reshape(B, -1).astype(compute_dtype)
    w1c, w2c, w3c = (w.astype(compute_dtype) for w in (w1, w2, w3))
    b1f, b2f, b3f = (b.astype(jnp.float32) for b in (b1, b2, b3))

    TM = _choose_tm(B, tm)
    grid = (pl.cdiv(B, TM),)

    def const_spec(shape):
        # Constant index map -> VMEM-resident across all grid steps.
        if single_buffer_weights:
            return pl.BlockSpec(shape, lambda i: (0, 0), pipeline_mode=pl.Buffered(1))
        return pl.BlockSpec(shape, lambda i: (0, 0))

    wbytes = jnp.dtype(compute_dtype).itemsize
    out = pl.pallas_call(
        mlp_kernel,
        out_shape=jax.ShapeDtypeStruct((B, n_out), jnp.float32),
        grid=grid,
        in_specs=[
            pl.BlockSpec((TM, K), lambda i: (i, 0)),   # streamed x tiles
            const_spec(w1c.shape),
            const_spec(b1f.shape),
            const_spec(w2c.shape),
            const_spec(b2f.shape),
            const_spec(w3c.shape),
            const_spec(b3f.shape),
        ],
        out_specs=pl.BlockSpec((TM, n_out), lambda i: (i, 0)),
        compiler_params=pltpu.CompilerParams(
            dimension_semantics=("parallel",),  # 2-TC sharding on v7x
            vmem_limit_bytes=_vmem_limit_bytes(
                TM, K, size, n_out, wbytes, single_buffer_weights
            ),
        ),
    )(x_flat, w1c, b1f, w2c, b2f, w3c, b3f)
    return out


_SINGLE_BUFFER_WEIGHTS = None  # resolved once at first call


def net1_forward(x, params, *, tm=1024, compute_dtype=jnp.bfloat16):
    """x: (B, 20, 10). Returns logits (B, 5) float32.

    compute_dtype=jnp.bfloat16 streams x/weights as bf16 with f32 MXU
    accumulation (2x HBM, ~3x MXU win); pass jnp.float32 for exact f32 math.
    """
    global _SINGLE_BUFFER_WEIGHTS
    if _SINGLE_BUFFER_WEIGHTS is None:
        try:
            out = _net1_forward(
                x, params, tm=tm, compute_dtype=compute_dtype,
                single_buffer_weights=True,
            )
            jax.block_until_ready(out)
            _SINGLE_BUFFER_WEIGHTS = True
            return out
        except Exception:
            # pipeline_mode=pl.Buffered(1) unsupported on this jax build; fall
            # back to default (double-buffered) resident weights.
            _SINGLE_BUFFER_WEIGHTS = False
    return _net1_forward(
        x, params, tm=tm, compute_dtype=compute_dtype,
        single_buffer_weights=_SINGLE_BUFFER_WEIGHTS,
    )


def init_params(key, size):
    """Deterministic init matching the torch module's layer shapes.

    Linear(200, size), Linear(size, size), Linear(size, 5).
    Weights stored as (in, out); biases as (1, out) for TPU 2-D friendliness.
    """
    k1, k2, k3, k4, k5, k6 = jax.random.split(key, 6)
    in1 = 20 * 10

    def uinit(k, shape, fan_in):
        bound = 1.0 / jnp.sqrt(fan_in)
        return jax.random.uniform(k, shape, jnp.float32, -bound, bound)

    w1 = uinit(k1, (in1, size), in1)
    b1 = uinit(k2, (1, size), in1)
    w2 = uinit(k3, (size, size), size)
    b2 = uinit(k4, (1, size), size)
    w3 = uinit(k5, (size, 5), size)
    b3 = uinit(k6, (1, 5), size)
    return (w1, b1, w2, b2, w3, b3)


def reference_forward(x, params, dtype=jnp.float32):
    """Pure-JAX reference with the same dtype policy as the kernel."""
    w1, b1, w2, b2, w3, b3 = params
    xf = x.reshape(x.shape[0], -1).astype(dtype)
    w1, w2, w3 = (w.astype(dtype) for w in (w1, w2, w3))
    h1 = jnp.maximum(
        jnp.dot(xf, w1, preferred_element_type=jnp.float32) + b1, 0.0
    ).astype(dtype)
    h2 = jnp.maximum(
        jnp.dot(h1, w2, preferred_element_type=jnp.float32) + b2, 0.0
    ).astype(dtype)
    return jnp.dot(h2, w3, preferred_element_type=jnp.float32) + b3


if __name__ == "__main__":
    size = 32
    key = jax.random.PRNGKey(0)
    kx, kp, kx2 = jax.random.split(key, 3)
    params = init_params(kp, size)

    # Case 1: tiny batch (single ragged tile, grid=(1,)).
    x = jax.random.normal(kx, (2, 20, 10), jnp.float32)
    out = jax.block_until_ready(net1_forward(x, params))
    assert out.shape == (2, 5) and out.dtype == jnp.float32
    ref_m = reference_forward(x, params, jnp.bfloat16)   # matched precision
    ref_f = reference_forward(x, params, jnp.float32)    # module semantics
    assert jnp.allclose(out, ref_m, atol=5e-3, rtol=1e-2)
    assert jnp.allclose(out, ref_f, atol=1e-1, rtol=1e-1)

    # Case 2: multi-step grid with a ragged last block (B=300 -> TM=152, 2 steps).
    x2 = jax.random.normal(kx2, (300, 20, 10), jnp.float32)
    out2 = jax.block_until_ready(net1_forward(x2, params))
    assert out2.shape == (300, 5)
    ref2_m = reference_forward(x2, params, jnp.bfloat16)
    ref2_f = reference_forward(x2, params, jnp.float32)
    assert jnp.allclose(out2, ref2_m, atol=5e-3, rtol=1e-2)
    assert jnp.allclose(out2, ref2_f, atol=1e-1, rtol=1e-1)

    print("KERNEL_OK")
</pallas_src>

<mosaic_0001>
module attributes {stable_mosaic.version = 11 : i64} {
  func.func @mlp_kernel(%arg0: i32, %arg1: memref<2x200xbf16, #tpu.memory_space<vmem>>, %arg2: memref<200x32xbf16, #tpu.memory_space<vmem>>, %arg3: memref<1x32xf32, #tpu.memory_space<vmem>>, %arg4: memref<32x32xbf16, #tpu.memory_space<vmem>>, %arg5: memref<1x32xf32, #tpu.memory_space<vmem>>, %arg6: memref<32x5xbf16, #tpu.memory_space<vmem>>, %arg7: memref<1x5xf32, #tpu.memory_space<vmem>>, %arg8: memref<2x5xf32, #tpu.memory_space<vmem>>) attributes {dimension_semantics = [#tpu.dimension_semantics<parallel>], iteration_bounds = array<i64: 1>, scalar_prefetch = 0 : i64, scratch_operands = 0 : i64, tpu.core_type = #tpu.core_type<tc>, window_params = [{transform_indices = @transform_0, window_bounds = array<i64: 2, 200>}, {pipeline_mode = #tpu.pipeline_mode<synchronous>, transform_indices = @transform_1, window_bounds = array<i64: 200, 32>}, {pipeline_mode = #tpu.pipeline_mode<synchronous>, transform_indices = @transform_2, window_bounds = array<i64: 1, 32>}, {pipeline_mode = #tpu.pipeline_mode<synchronous>, transform_indices = @transform_3, window_bounds = array<i64: 32, 32>}, {pipeline_mode = #tpu.pipeline_mode<synchronous>, transform_indices = @transform_4, window_bounds = array<i64: 1, 32>}, {pipeline_mode = #tpu.pipeline_mode<synchronous>, transform_indices = @transform_5, window_bounds = array<i64: 32, 5>}, {pipeline_mode = #tpu.pipeline_mode<synchronous>, transform_indices = @transform_6, window_bounds = array<i64: 1, 5>}, {transform_indices = @transform_7, window_bounds = array<i64: 2, 5>}]} {
    %c0 = arith.constant 0 : index
    %c0_0 = arith.constant 0 : index
    %0 = vector.load %arg1[%c0, %c0_0] : memref<2x200xbf16, #tpu.memory_space<vmem>>, vector<2x200xbf16>
    %c0_1 = arith.constant 0 : index
    %c0_2 = arith.constant 0 : index
    %1 = vector.load %arg2[%c0_1, %c0_2] : memref<200x32xbf16, #tpu.memory_space<vmem>>, vector<200x32xbf16>
    %cst = arith.constant dense<0.000000e+00> : vector<2x32xf32>
    %2 = tpu.matmul %0, %1, %cst {dimension_numbers = #tpu.dot_dimension_numbers<[1], [0], [0], [1], [0, 0, 1, 1], [], []>} : vector<2x200xbf16>, vector<200x32xbf16>, vector<2x32xf32> -> vector<2x32xf32>
    %c0_3 = arith.constant 0 : index
    %c0_4 = arith.constant 0 : index
    %3 = vector.load %arg3[%c0_3, %c0_4] : memref<1x32xf32, #tpu.memory_space<vmem>>, vector<1x32xf32>
    %4 = vector.broadcast %3 : vector<1x32xf32> to vector<2x32xf32>
    %5 = arith.addf %2, %4 : vector<2x32xf32>
    %cst_5 = arith.constant 0.000000e+00 : f32
    %6 = vector.broadcast %cst_5 : f32 to vector<2x32xf32>
    %7 = arith.maximumf %5, %6 : vector<2x32xf32>
    %8 = arith.truncf %7 : vector<2x32xf32> to vector<2x32xbf16>
    %c0_6 = arith.constant 0 : index
    %c0_7 = arith.constant 0 : index
    %9 = vector.load %arg4[%c0_6, %c0_7] : memref<32x32xbf16, #tpu.memory_space<vmem>>, vector<32x32xbf16>
    %cst_8 = arith.constant dense<0.000000e+00> : vector<2x32xf32>
    %10 = tpu.matmul %8, %9, %cst_8 {dimension_numbers = #tpu.dot_dimension_numbers<[1], [0], [0], [1], [0, 0, 1, 1], [], []>} : vector<2x32xbf16>, vector<32x32xbf16>, vector<2x32xf32> -> vector<2x32xf32>
    %c0_9 = arith.constant 0 : index
    %c0_10 = arith.constant 0 : index
    %11 = vector.load %arg5[%c0_9, %c0_10] : memref<1x32xf32, #tpu.memory_space<vmem>>, vector<1x32xf32>
    %12 = vector.broadcast %11 : vector<1x32xf32> to vector<2x32xf32>
    %13 = arith.addf %10, %12 : vector<2x32xf32>
    %cst_11 = arith.constant 0.000000e+00 : f32
    %14 = vector.broadcast %cst_11 : f32 to vector<2x32xf32>
    %15 = arith.maximumf %13, %14 : vector<2x32xf32>
    %16 = arith.truncf %15 : vector<2x32xf32> to vector<2x32xbf16>
    %c0_12 = arith.constant 0 : index
    %c0_13 = arith.constant 0 : index
    %17 = vector.load %arg6[%c0_12, %c0_13] : memref<32x5xbf16, #tpu.memory_space<vmem>>, vector<32x5xbf16>
    %cst_14 = arith.constant dense<0.000000e+00> : vector<2x5xf32>
    %18 = tpu.matmul %16, %17, %cst_14 {dimension_numbers = #tpu.dot_dimension_numbers<[1], [0], [0], [1], [0, 0, 1, 1], [], []>} : vector<2x32xbf16>, vector<32x5xbf16>, vector<2x5xf32> -> vector<2x5xf32>
    %c0_15 = arith.constant 0 : index
    %c0_16 = arith.constant 0 : index
    %19 = vector.load %arg7[%c0_15, %c0_16] : memref<1x5xf32, #tpu.memory_space<vmem>>, vector<1x5xf32>
    %20 = vector.broadcast %19 : vector<1x5xf32> to vector<2x5xf32>
    %21 = arith.addf %18, %20 : vector<2x5xf32>
    %c0_17 = arith.constant 0 : index
    %c0_18 = arith.constant 0 : index
    %22 = vector.load %arg8[%c0_17, %c0_18] : memref<2x5xf32, #tpu.memory_space<vmem>>, vector<2x5xf32>
    tpu.vector_store %arg8[%c0_17, %c0_18], %21 {strides = array<i32>} : memref<2x5xf32, #tpu.memory_space<vmem>>, vector<2x5xf32>,
    return
  }
  func.func @transform_0(%arg0: i32) -> (i32, i32) {
    %c0_i32 = arith.constant 0 : i32
    %c0_i32_0 = arith.constant 0 : i32
    return %arg0, %c0_i32 : i32, i32
  }
  func.func @transform_1(%arg0: i32) -> (i32, i32) {
    %c0_i32 = arith.constant 0 : i32
    %c0_i32_0 = arith.constant 0 : i32
    %c0_i32_1 = arith.constant 0 : i32
    return %c0_i32, %c0_i32_0 : i32, i32
  }
  func.func @transform_2(%arg0: i32) -> (i32, i32) {
    %c0_i32 = arith.constant 0 : i32
    %c0_i32_0 = arith.constant 0 : i32
    %c0_i32_1 = arith.constant 0 : i32
    return %c0_i32, %c0_i32_0 : i32, i32
  }
  func.func @transform_3(%arg0: i32) -> (i32, i32) {
    %c0_i32 = arith.constant 0 : i32
    %c0_i32_0 = arith.constant 0 : i32
    %c0_i32_1 = arith.constant 0 : i32
    return %c0_i32, %c0_i32_0 : i32, i32
  }
  func.func @transform_4(%arg0: i32) -> (i32, i32) {
    %c0_i32 = arith.constant 0 : i32
    %c0_i32_0 = arith.constant 0 : i32
    %c0_i32_1 = arith.constant 0 : i32
    return %c0_i32, %c0_i32_0 : i32, i32
  }
  func.func @transform_5(%arg0: i32) -> (i32, i32) {
    %c0_i32 = arith.constant 0 : i32
    %c0_i32_0 = arith.constant 0 : i32
    %c0_i32_1 = arith.constant 0 : i32
    return %c0_i32, %c0_i32_0 : i32, i32
  }
  func.func @transform_6(%arg0: i32) -> (i32, i32) {
    %c0_i32 = arith.constant 0 : i32
    %c0_i32_0 = arith.constant 0 : i32
    %c0_i32_1 = arith.constant 0 : i32
    return %c0_i32, %c0_i32_0 : i32, i32
  }
  func.func @transform_7(%arg0: i32) -> (i32, i32) {
    %c0_i32 = arith.constant 0 : i32
    %c0_i32_0 = arith.constant 0 : i32
    return %arg0, %c0_i32 : i32, i32
  }
}

module attributes {stable_mosaic.version = 11 : i64} {
  func.func @mlp_kernel(%arg0: i32, %arg1: memref<2x200xbf16, #tpu.memory_space<vmem>>, %arg2: memref<200x32xbf16, #tpu.memory_space<vmem>>, %arg3: memref<1x32xf32, #tpu.memory_space<vmem>>, %arg4: memref<32x32xbf16, #tpu.memory_space<vmem>>, %arg5: memref<1x32xf32, #tpu.memory_space<vmem>>, %arg6: memref<32x5xbf16, #tpu.memory_space<vmem>>, %arg7: memref<1x5xf32, #tpu.memory_space<vmem>>, %arg8: memref<2x5xf32, #tpu.memory_space<vmem>>) attributes {dimension_semantics = [#tpu.dimension_semantics<parallel>], iteration_bounds = array<i64: 1>, scalar_prefetch = 0 : i64, scratch_operands = 0 : i64, tpu.core_type = #tpu.core_type<tc>, window_params = [{transform_indices = @transform_0, window_bounds = array<i64: 2, 200>}, {pipeline_mode = #tpu.pipeline_mode<synchronous>, transform_indices = @transform_1, window_bounds = array<i64: 200, 32>}, {pipeline_mode = #tpu.pipeline_mode<synchronous>, transform_indices = @transform_2, window_bounds = array<i64: 1, 32>}, {pipeline_mode = #tpu.pipeline_mode<synchronous>, transform_indices = @transform_3, window_bounds = array<i64: 32, 32>}, {pipeline_mode = #tpu.pipeline_mode<synchronous>, transform_indices = @transform_4, window_bounds = array<i64: 1, 32>}, {pipeline_mode = #tpu.pipeline_mode<synchronous>, transform_indices = @transform_5, window_bounds = array<i64: 32, 5>}, {pipeline_mode = #tpu.pipeline_mode<synchronous>, transform_indices = @transform_6, window_bounds = array<i64: 1, 5>}, {transform_indices = @transform_7, window_bounds = array<i64: 2, 5>}]} {
    %c0 = arith.constant 0 : index
    %c0_0 = arith.constant 0 : index
    %0 = vector.load %arg1[%c0, %c0_0] : memref<2x200xbf16, #tpu.memory_space<vmem>>, vector<2x200xbf16>
    %c0_1 = arith.constant 0 : index
    %c0_2 = arith.constant 0 : index
    %1 = vector.load %arg2[%c0_1, %c0_2] : memref<200x32xbf16, #tpu.memory_space<vmem>>, vector<200x32xbf16>
    %cst = arith.constant dense<0.000000e+00> : vector<2x32xf32>
    %2 = tpu.matmul %0, %1, %cst {dimension_numbers = #tpu.dot_dimension_numbers<[1], [0], [0], [1], [0, 0, 1, 1], [], []>} : vector<2x200xbf16>, vector<200x32xbf16>, vector<2x32xf32> -> vector<2x32xf32>
    %c0_3 = arith.constant 0 : index
    %c0_4 = arith.constant 0 : index
    %3 = vector.load %arg3[%c0_3, %c0_4] : memref<1x32xf32, #tpu.memory_space<vmem>>, vector<1x32xf32>
    %4 = vector.broadcast %3 : vector<1x32xf32> to vector<2x32xf32>
    %5 = arith.addf %2, %4 : vector<2x32xf32>
    %cst_5 = arith.constant 0.000000e+00 : f32
    %6 = vector.broadcast %cst_5 : f32 to vector<2x32xf32>
    %7 = arith.maximumf %5, %6 : vector<2x32xf32>
    %8 = arith.truncf %7 : vector<2x32xf32> to vector<2x32xbf16>
    %c0_6 = arith.constant 0 : index
    %c0_7 = arith.constant 0 : index
    %9 = vector.load %arg4[%c0_6, %c0_7] : memref<32x32xbf16, #tpu.memory_space<vmem>>, vector<32x32xbf16>
    %cst_8 = arith.constant dense<0.000000e+00> : vector<2x32xf32>
    %10 = tpu.matmul %8, %9, %cst_8 {dimension_numbers = #tpu.dot_dimension_numbers<[1], [0], [0], [1], [0, 0, 1, 1], [], []>} : vector<2x32xbf16>, vector<32x32xbf16>, vector<2x32xf32> -> vector<2x32xf32>
    %c0_9 = arith.constant 0 : index
    %c0_10 = arith.constant 0 : index
    %11 = vector.load %arg5[%c0_9, %c0_10] : memref<1x32xf32, #tpu.memory_space<vmem>>, vector<1x32xf32>
    %12 = vector.broadcast %11 : vector<1x32xf32> to vector<2x32xf32>
    %13 = arith.addf %10, %12 : vector<2x32xf32>
    %cst_11 = arith.constant 0.000000e+00 : f32
    %14 = vector.broadcast %cst_11 : f32 to vector<2x32xf32>
    %15 = arith.maximumf %13, %14 : vector<2x32xf32>
    %16 = arith.truncf %15 : vector<2x32xf32> to vector<2x32xbf16>
    %c0_12 = arith.constant 0 : index
    %c0_13 = arith.constant 0 : index
    %17 = vector.load %arg6[%c0_12, %c0_13] : memref<32x5xbf16, #tpu.memory_space<vmem>>, vector<32x5xbf16>
    %cst_14 = arith.constant dense<0.000000e+00> : vector<2x5xf32>
    %18 = tpu.matmul %16, %17, %cst_14 {dimension_numbers = #tpu.dot_dimension_numbers<[1], [0], [0], [1], [0, 0, 1, 1], [], []>} : vector<2x32xbf16>, vector<32x5xbf16>, vector<2x5xf32> -> vector<2x5xf32>
    %c0_15 = arith.constant 0 : index
    %c0_16 = arith.constant 0 : index
    %19 = vector.load %arg7[%c0_15, %c0_16] : memref<1x5xf32, #tpu.memory_space<vmem>>, vector<1x5xf32>
    %20 = vector.broadcast %19 : vector<1x5xf32> to vector<2x5xf32>
    %21 = arith.addf %18, %20 : vector<2x5xf32>
    %c0_17 = arith.constant 0 : index
    %c0_18 = arith.constant 0 : index
    %22 = vector.load %arg8[%c0_17, %c0_18] : memref<2x5xf32, #tpu.memory_space<vmem>>, vector<2x5xf32>
    tpu.vector_store %arg8[%c0_17, %c0_18], %21 {strides = array<i32>} : memref<2x5xf32, #tpu.memory_space<vmem>>, vector<2x5xf32>,
    return
  }
  func.func @transform_0(%arg0: i32) -> (i32, i32) {
    %c0_i32 = arith.constant 0 : i32
    %c0_i32_0 = arith.constant 0 : i32
    return %arg0, %c0_i32 : i32, i32
  }
  func.func @transform_1(%arg0: i32) -> (i32, i32) {
    %c0_i32 = arith.constant 0 : i32
    %c0_i32_0 = arith.constant 0 : i32
    %c0_i32_1 = arith.constant 0 : i32
    return %c0_i32, %c0_i32_0 : i32, i32
  }
  func.func @transform_2(%arg0: i32) -> (i32, i32) {
    %c0_i32 = arith.constant 0 : i32
    %c0_i32_0 = arith.constant 0 : i32
    %c0_i32_1 = arith.constant 0 : i32
    return %c0_i32, %c0_i32_0 : i32, i32
  }
  func.func @transform_3(%arg0: i32) -> (i32, i32) {
    %c0_i32 = arith.constant 0 : i32
    %c0_i32_0 = arith.constant 0 : i32
    %c0_i32_1 = arith.constant 0 : i32
    return %c0_i32, %c0_i32_0 : i32, i32
  }
  func.func @transform_4(%arg0: i32) -> (i32, i32) {
    %c0_i32 = arith.constant 0 : i32
    %c0_i32_0 = arith.constant 0 : i32
    %c0_i32_1 = arith.constant 0 : i32
    return %c0_i32, %c0_i32_0 : i32, i32
  }
  func.func @transform_5(%arg0: i32) -> (i32, i32) {
    %c0_i32 = arith.constant 0 : i32
    %c0_i32_0 = arith.constant 0 : i32
    %c0_i32_1 = arith.constant 0 : i32
    return %c0_i32, %c0_i32_0 : i32, i32
  }
  func.func @transform_6(%arg0: i32) -> (i32, i32) {
    %c0_i32 = arith.constant 0 : i32
    %c0_i32_0 = arith.constant 0 : i32
    %c0_i32_1 = arith.constant 0 : i32
    return %c0_i32, %c0_i32_0 : i32, i32
  }
  func.func @transform_7(%arg0: i32) -> (i32, i32) {
    %c0_i32 = arith.constant 0 : i32
    %c0_i32_0 = arith.constant 0 : i32
    return %arg0, %c0_i32 : i32, i32
  }
}

</mosaic_0001>

<bundles_post_ra>
// kernel: _net1_forward.1
= control target key start
LH: loop header
LB: loop body
LE: loop exit
PB: predicated region body
PF: predicated region fallthrough
CT: control target
= control target key end

     0   :  { %vm141_vm0 = vcmask 1043456   ;;  %s486_s0 = inlined_call_operand.vmem [shape: bf16[2,200], index: 0, kind: input, shape index: {}]   ;;  %s487_s1 = inlined_call_operand.vmem [shape: bf16[200,32], index: 1, kind: input, shape index: {}]   ;;  %s488_s2 = inlined_call_operand.vmem [shape: f32[1,32], index: 2, kind: input, shape index: {}]   ;;  %s489_s3 = inlined_call_operand.vmem [shape: bf16[32,32], index: 3, kind: input, shape index: {}]   ;;  %s490_s4 = inlined_call_operand.vmem [shape: f32[1,32], index: 4, kind: input, shape index: {}]   ;;  %s491_s5 = inlined_call_operand.vmem [shape: bf16[32,5], index: 5, kind: input, shape index: {}]   ;;  %s492_s6 = inlined_call_operand.vmem [shape: f32[1,5], index: 6, kind: input, shape index: {}]   ;;  %s493_s7 = inlined_call_operand.hbm [shape: f32[2,5], index: 7, kind: output, shape index: {}]  }
   0x1   :  { %v340_v0 = vld [vmem:[%s487_s1 + $0x38] sm:$0xff]  ;;  %v53_v1 = vld [vmem:[%s487_s1 + $0x60] sm:$0xf]  ;;  %v339_v3 = vld [vmem:[%s487_s1 + $0x30] sm:$0xff] }
   0x2   :  { %v112_v2 = vunpack.c.l.b16 %v53_v1  ;;  %145 = vmatpush.bf16.msra.mxu0 %v340_v0  ;;  %v28_v5 = vld [vmem:[%s486_s0] sm:$0x3]  ;;  %v338_v7 = vld [vmem:[%s487_s1 + $0x28] sm:$0xff]  ;;  %v344_v8 = vld [vmem:[%s487_s1 + $0x58] sm:$0xff] }
   0x3   :  { %59 = vst [vmem:[#allocation1] ss:$9 sm:$0xff] %v28_v5 }
   0x4   :  { %v125_v4 = vpack.c.b16 %v112_v2, %v112_v2 }
   0x6   :  { %v143_v6 = vsel %vm141_vm0, %v125_v4, 0  ;;  %146 = vmatpush.bf16.msra.mxu0 %v339_v3 }
   0x7   :  { %161 = vmatpush.bf16.msra.mxu1 %v143_v6 }
   0x8   :  { %12 = vsyncpa [#allocation3], 0  ;;  %v337_v9 = vld [vmem:[%s487_s1 + $0x20] sm:$0xff]  ;;  %v343_v10 = vld [vmem:[%s487_s1 + $0x50] sm:$0xff]  ;;  %vm138_vm1 = vcmask 588800   ;;  %vm193_vm2 = vcmask 261120  }
   0x9   :  { %v336_v11 = vld [vmem:[%s487_s1 + $0x18] sm:$0xff]  ;;  %v342_v12 = vld [vmem:[%s487_s1 + $0x48] sm:$0xff]  ;;  %v335_v13 = vld [vmem:[%s487_s1 + $0x10] sm:$0xff]  ;;  %s379_s15 = smov [#allocation2]   ;;  %vm248_vm3 = vcmask 33792  }
   0xa   :  { %147 = vmatpush.bf16.msra.mxu0 %v338_v7  ;;  %v341_v14 = vld [vmem:[%s487_s1 + $0x40] sm:$0xff]  ;;  %v334_v15 = vld [vmem:[%s487_s1 + $0x8] sm:$0xff]  ;;  %s255_s16 = sshll.u32 %s379_s15, 4  ;;  %s256_s16 = int_to_ptr.vmem [resolvable:$true] %s255_s16 }
   0xb   :  { %162 = vmatpush.bf16.msra.mxu1 %v344_v8  ;;  %v61_v16 = vld [vmem:[#allocation1 + $0x9] sm:$0xff]  ;;  %v333_v17 = vld [vmem:[%s487_s1] sm:$0xff] }
   0xc   :  { %v60_v18 = vld [vmem:[#allocation1] sm:$0xff]  ;;  %v346_v19 = vld [vmem:[%s489_s3 + $0x8] sm:$0xff] }
   0xd   :  { %203 = vmatpush.bf16.msra.mxu2 %v346_v19  ;;  %v345_v20 = vld [vmem:[%s489_s3] sm:$0xff]  ;;  %v348_v30 = vld [vmem:[%s491_s5 + $0x8] sm:$0xff] }
   0xe   :  { %148 = vmatpush.bf16.msra.mxu0 %v337_v9  ;;  %v350_v22 = vld [vmem:[%s488_s2] ss:$0 sm:$0xff]  ;;  %241 = vmatpush.bf16.msra.mxu3 %v348_v30 }
   0xf   :  { %163 = vmatpush.bf16.msra.mxu1 %v343_v10  ;;  %v347_v31 = vld [vmem:[%s491_s5] sm:$0xff]  ;;  %s257_s5 = sshll.u32 %s493_s7, 4  ;;  %s258_s5 = int_to_ptr.hbm [resolvable:$true] %s257_s5 }
  0x10   :  { %v351_v32 = vld [vmem:[%s490_s4] ss:$0 sm:$0xff] }
  0x11   :  { %204 = vmatpush.bf16.msra.mxu2 %v345_v20  ;;  %v352_v38 = vld [vmem:[%s492_s6] ss:$0 sm:$0xff] }
  0x12   :  { %149 = vmatpush.bf16.msra.mxu0 %v336_v11  ;;  %242 = vmatpush.bf16.msra.mxu3 %v347_v31 }
  0x13   :  { %164 = vmatpush.bf16.msra.mxu1 %v342_v12 }
  0x16   :  { %150 = vmatpush.bf16.msra.mxu0 %v335_v13 }
  0x17   :  { %165 = vmatpush.bf16.msra.mxu1 %v341_v14 }
  0x1a   :  { %314 = vmatmul.msk.bf16.vlgmr.msra.gmra.mxu1 %vm138_vm1, %v61_v16  ;;  %151 = vmatpush.bf16.msra.mxu0 %v334_v15 }
  0x1e   :  { %152 = vmatpush.bf16.msra.mxu0 %v333_v17 }
  0x21   :  { %153 = vmatmul.bf16.vlgmr.msra.gmra.mxu0 %v60_v18 }
  0x97   :  { %v167_v21 = vpop.f32.mrf.mxu1 }
  0x9e   :  { %v154_v23 = vpop.f32.mrf.mxu0 }
  0x9f   :  { %v169_v24 = vpop.f32.mrf.mxu1  ;;  %v155_v25 = vadd.f32 %v350_v22, %v154_v23 }
  0xa1   :  { %v168_v26 = vadd.f32 %v167_v21, %v155_v25 }
  0xa3   :  { %v171_v27 = vmax.f32 %v168_v26, 0.0 }
  0xa5   :  { %v172_v28 = vpack.c.bf16 %v171_v27, %v171_v27 }
  0xa6   :  { %v156_v29 = vpop.f32.mrf.mxu0 }
  0xa7   :  { %323 = vmatmul.msk.bf16.vlgmr.msra.gmra.mxu2 %vm193_vm2, %v172_v28 }
 0x12a   :  { %v206_v33 = vpop.f32.mrf.mxu2 }
 0x12b   :  { %v207_v34 = vadd.f32 %v351_v32, %v206_v33 }
 0x12d   :  { %v210_v35 = vmax.f32 %v207_v34, 0.0 }
 0x12f   :  { %v211_v36 = vpack.c.bf16 %v210_v35, %v210_v35 }
 0x131   :  { %332 = vmatmul.msk.bf16.vlgmr.msra.gmra.mxu3 %vm193_vm2, %v211_v36 }
 0x132   :  { %v208_v37 = vpop.f32.mrf.mxu2 }
 0x1b4   :  { %v244_v39 = vpop.f32.mrf.mxu3 }
 0x1b5   :  { %v245_v40 = vadd.f32 %v352_v38, %v244_v39 }
 0x1b7   :  { %249 = vst.msk [vmem:[#allocation2] sm:$0x3] %vm248_vm3, %v245_v40 }
 0x1b8   :  { %260 = dma.vmem_to_hbm [thread:$0]  %s256_s16, 32, %s258_s5, [#allocation3]  }
 0x1bc   :  { %v246_v41 = vpop.f32.mrf.mxu3 }
 0x1bd   :  { %377 = dma.done.wait [#allocation3], 32  }
 0x1be   :  { %378 = vsyncadd [#allocation3], 4294967264 }
 0x1bf   :  { %265 = vsyncpa [#allocation3], 1 }

// kernel: _net1_forward.1
= control target key start
LH: loop header
LB: loop body
LE: loop exit
PB: predicated region body
PF: predicated region fallthrough
CT: control target
= control target key end

     0   :  { %vm141_vm0 = vcmask 1043456   ;;  %s486_s0 = inlined_call_operand.vmem [shape: bf16[2,200], index: 0, kind: input, shape index: {}]   ;;  %s487_s1 = inlined_call_operand.vmem [shape: bf16[200,32], index: 1, kind: input, shape index: {}]   ;;  %s488_s2 = inlined_call_operand.vmem [shape: f32[1,32], index: 2, kind: input, shape index: {}]   ;;  %s489_s3 = inlined_call_operand.vmem [shape: bf16[32,32], index: 3, kind: input, shape index: {}]   ;;  %s490_s4 = inlined_call_operand.vmem [shape: f32[1,32], index: 4, kind: input, shape index: {}]   ;;  %s491_s5 = inlined_call_operand.vmem [shape: bf16[32,5], index: 5, kind: input, shape index: {}]   ;;  %s492_s6 = inlined_call_operand.vmem [shape: f32[1,5], index: 6, kind: input, shape index: {}]   ;;  %s493_s7 = inlined_call_operand.hbm [shape: f32[2,5], index: 7, kind: output, shape index: {}]  }
   0x1   :  { %v340_v0 = vld [vmem:[%s487_s1 + $0x38] sm:$0xff]  ;;  %v53_v1 = vld [vmem:[%s487_s1 + $0x60] sm:$0xf]  ;;  %v339_v3 = vld [vmem:[%s487_s1 + $0x30] sm:$0xff] }
   0x2   :  { %v112_v2 = vunpack.c.l.b16 %v53_v1  ;;  %145 = vmatpush.bf16.msra.mxu0 %v340_v0  ;;  %v28_v5 = vld [vmem:[%s486_s0] sm:$0x3]  ;;  %v338_v7 = vld [vmem:[%s487_s1 + $0x28] sm:$0xff]  ;;  %v344_v8 = vld [vmem:[%s487_s1 + $0x58] sm:$0xff] }
   0x3   :  { %59 = vst [vmem:[#allocation1] ss:$9 sm:$0xff] %v28_v5 }
   0x4   :  { %v125_v4 = vpack.c.b16 %v112_v2, %v112_v2 }
   0x6   :  { %v143_v6 = vsel %vm141_vm0, %v125_v4, 0  ;;  %146 = vmatpush.bf16.msra.mxu0 %v339_v3 }
   0x7   :  { %161 = vmatpush.bf16.msra.mxu1 %v143_v6 }
   0x8   :  { %12 = vsyncpa [#allocation3], 0  ;;  %v337_v9 = vld [vmem:[%s487_s1 + $0x20] sm:$0xff]  ;;  %v343_v10 = vld [vmem:[%s487_s1 + $0x50] sm:$0xff]  ;;  %vm138_vm1 = vcmask 588800   ;;  %vm193_vm2 = vcmask 261120  }
   0x9   :  { %v336_v11 = vld [vmem:[%s487_s1 + $0x18] sm:$0xff]  ;;  %v342_v12 = vld [vmem:[%s487_s1 + $0x48] sm:$0xff]  ;;  %v335_v13 = vld [vmem:[%s487_s1 + $0x10] sm:$0xff]  ;;  %s379_s15 = smov [#allocation2]   ;;  %vm248_vm3 = vcmask 33792  }
   0xa   :  { %147 = vmatpush.bf16.msra.mxu0 %v338_v7  ;;  %v341_v14 = vld [vmem:[%s487_s1 + $0x40] sm:$0xff]  ;;  %v334_v15 = vld [vmem:[%s487_s1 + $0x8] sm:$0xff]  ;;  %s255_s16 = sshll.u32 %s379_s15, 4  ;;  %s256_s16 = int_to_ptr.vmem [resolvable:$true] %s255_s16 }
   0xb   :  { %162 = vmatpush.bf16.msra.mxu1 %v344_v8  ;;  %v61_v16 = vld [vmem:[#allocation1 + $0x9] sm:$0xff]  ;;  %v333_v17 = vld [vmem:[%s487_s1] sm:$0xff] }
   0xc   :  { %v60_v18 = vld [vmem:[#allocation1] sm:$0xff]  ;;  %v346_v19 = vld [vmem:[%s489_s3 + $0x8] sm:$0xff] }
   0xd   :  { %203 = vmatpush.bf16.msra.mxu2 %v346_v19  ;;  %v345_v20 = vld [vmem:[%s489_s3] sm:$0xff]  ;;  %v348_v30 = vld [vmem:[%s491_s5 + $0x8] sm:$0xff] }
   0xe   :  { %148 = vmatpush.bf16.msra.mxu0 %v337_v9  ;;  %v350_v22 = vld [vmem:[%s488_s2] ss:$0 sm:$0xff]  ;;  %241 = vmatpush.bf16.msra.mxu3 %v348_v30 }
   0xf   :  { %163 = vmatpush.bf16.msra.mxu1 %v343_v10  ;;  %v347_v31 = vld [vmem:[%s491_s5] sm:$0xff]  ;;  %s257_s5 = sshll.u32 %s493_s7, 4  ;;  %s258_s5 = int_to_ptr.hbm [resolvable:$true] %s257_s5 }
  0x10   :  { %v351_v32 = vld [vmem:[%s490_s4] ss:$0 sm:$0xff] }
  0x11   :  { %204 = vmatpush.bf16.msra.mxu2 %v345_v20  ;;  %v352_v38 = vld [vmem:[%s492_s6] ss:$0 sm:$0xff] }
  0x12   :  { %149 = vmatpush.bf16.msra.mxu0 %v336_v11  ;;  %242 = vmatpush.bf16.msra.mxu3 %v347_v31 }
  0x13   :  { %164 = vmatpush.bf16.msra.mxu1 %v342_v12 }
  0x16   :  { %150 = vmatpush.bf16.msra.mxu0 %v335_v13 }
  0x17   :  { %165 = vmatpush.bf16.msra.mxu1 %v341_v14 }
  0x1a   :  { %314 = vmatmul.msk.bf16.vlgmr.msra.gmra.mxu1 %vm138_vm1, %v61_v16  ;;  %151 = vmatpush.bf16.msra.mxu0 %v334_v15 }
  0x1e   :  { %152 = vmatpush.bf16.msra.mxu0 %v333_v17 }
  0x21   :  { %153 = vmatmul.bf16.vlgmr.msra.gmra.mxu0 %v60_v18 }
  0x97   :  { %v167_v21 = vpop.f32.mrf.mxu1 }
  0x9e   :  { %v154_v23 = vpop.f32.mrf.mxu0 }
  0x9f   :  { %v169_v24 = vpop.f32.mrf.mxu1  ;;  %v155_v25 = vadd.f32 %v350_v22, %v154_v23 }
  0xa1   :  { %v168_v26 = vadd.f32 %v167_v21, %v155_v25 }
  0xa3   :  { %v171_v27 = vmax.f32 %v168_v26, 0.0 }
  0xa5   :  { %v172_v28 = vpack.c.bf16 %v171_v27, %v171_v27 }
  0xa6   :  { %v156_v29 = vpop.f32.mrf.mxu0 }
  0xa7   :  { %323 = vmatmul.msk.bf16.vlgmr.msra.gmra.mxu2 %vm193_vm2, %v172_v28 }
 0x12a   :  { %v206_v33 = vpop.f32.mrf.mxu2 }
 0x12b   :  { %v207_v34 = vadd.f32 %v351_v32, %v206_v33 }
 0x12d   :  { %v210_v35 = vmax.f32 %v207_v34, 0.0 }
 0x12f   :  { %v211_v36 = vpack.c.bf16 %v210_v35, %v210_v35 }
 0x131   :  { %332 = vmatmul.msk.bf16.vlgmr.msra.gmra.mxu3 %vm193_vm2, %v211_v36 }
 0x132   :  { %v208_v37 = vpop.f32.mrf.mxu2 }
 0x1b4   :  { %v244_v39 = vpop.f32.mrf.mxu3 }
 0x1b5   :  { %v245_v40 = vadd.f32 %v352_v38, %v244_v39 }
 0x1b7   :  { %249 = vst.msk [vmem:[#allocation2] sm:$0x3] %vm248_vm3, %v245_v40 }
 0x1b8   :  { %260 = dma.vmem_to_hbm [thread:$0]  %s256_s16, 32, %s258_s5, [#allocation3]  }
 0x1bc   :  { %v246_v41 = vpop.f32.mrf.mxu3 }
 0x1bd   :  { %377 = dma.done.wait [#allocation3], 32  }
 0x1be   :  { %378 = vsyncadd [#allocation3], 4294967264 }
 0x1bf   :  { %265 = vsyncpa [#allocation3], 1 }

</bundles_post_ra>
